<compile_context>
chip_gen: v7x
topology: tpu7x:2x2x1
jax: 0.10.0
libtpu: 0.0.40
codegen_flags: <defaults>
</compile_context>

<pallas_src>
import numpy as np
import jax
import jax.numpy as jnp
from jax.experimental import pallas as pl
from jax.experimental.pallas import tpu as pltpu

D_MODEL = 256
IMG_CHANNELS = 1024
IMG_HW = 14 * 14
NUM_FUNCTIONS = 14
QUESTION_VOCAB = 1000
PROG_VOCAB = 200
HEAD_WIDTH = 128                    # out head (4) + fn head (14), lane-dense pad to 128
INP_PAD = 128                       # [mean bbox(4) | has_input(1)] padded to a full lane tile
K_COMP = IMG_CHANNELS + D_MODEL + D_MODEL + INP_PAD   # 1664 composite contraction dim
TB_MIN = 16                         # bf16 sublane pack
MAX_SINGLE_TILE = 256               # grid=1 up to this many rows; 256-row tiles beyond


def _round_up(n, m):
    return ((n + m - 1) // m) * m


# --------------------------------- kernel ----------------------------------

def _composite_kernel(x_ref,    # [TB, K_COMP]      bf16  composite activation rows
                      w_ref,    # [K_COMP, 128]     bf16  fully folded weight
                      b_ref,    # [1, 128]          f32   fully folded bias
                      o_ref):   # [TB, 128]         f32   packed heads (out | fn | pad)
    o_ref[...] = (jnp.dot(x_ref[...], w_ref[...],
                          preferred_element_type=jnp.float32) + b_ref[...])


def _composite_heads(x, w_comp, b_comp):
    """One pallas_call: [B, K_COMP] bf16 -> [B, 128] f32 packed heads."""
    nb = x.shape[0]
    if nb <= MAX_SINGLE_TILE:
        tb = _round_up(max(nb, TB_MIN), TB_MIN)     # whole batch in one tile, grid=1
    else:
        tb = MAX_SINGLE_TILE
    bp = _round_up(nb, tb)
    if bp != nb:
        x = jnp.pad(x, ((0, bp - nb), (0, 0)))      # garbage padded rows sliced off below
    n_tiles = bp // tb

    flops = 2 * bp * K_COMP * HEAD_WIDTH
    bytes_accessed = (bp * K_COMP * 2                      # bf16 activations
                      + K_COMP * HEAD_WIDTH * 2            # bf16 composite weight
                      + HEAD_WIDTH * 4                     # f32 bias
                      + bp * HEAD_WIDTH * 4)               # f32 output

    heads = pl.pallas_call(
        _composite_kernel,
        out_shape=jax.ShapeDtypeStruct((bp, HEAD_WIDTH), jnp.float32),
        grid=(n_tiles,),
        in_specs=[
            pl.BlockSpec((tb, K_COMP), lambda i: (i, 0)),
            pl.BlockSpec((K_COMP, HEAD_WIDTH), lambda i: (0, 0)),   # VMEM-resident
            pl.BlockSpec((1, HEAD_WIDTH), lambda i: (0, 0)),
        ],
        out_specs=pl.BlockSpec((tb, HEAD_WIDTH), lambda i: (i, 0)),
        compiler_params=pltpu.CompilerParams(
            # grid=1 (single TC, weights fetched once) for small batches;
            # only shard across cores when there are multiple 256-row tiles.
            dimension_semantics=("parallel",) if n_tiles > 1 else ("arbitrary",)),
        cost_estimate=pl.CostEstimate(
            flops=flops, transcendentals=0, bytes_accessed=bytes_accessed),
    )(x, w_comp, b_comp)
    return heads[:nb]


# ------------------------------ param packing -------------------------------

def pack_params(params):
    """One-time fold of all affine stages into a single composite weight/bias.
    All folds are computed in f32; only the final composite is cast to bf16."""
    w_fuse = params["w_fuse"]                                  # [1024, 256] (in, out)
    wf_img, wf_q, wf_in, wf_prog = (w_fuse[0:256], w_fuse[256:512],
                                    w_fuse[512:768], w_fuse[768:1024])

    # Pack the two heads lane-dense: cols 0:4 = output_head, 4:18 = function_head.
    w_head = jnp.zeros((D_MODEL, HEAD_WIDTH), jnp.float32)
    w_head = w_head.at[:, 0:4].set(params["w_out"])
    w_head = w_head.at[:, 4:4 + NUM_FUNCTIONS].set(params["w_fn"])
    b_head = jnp.zeros((HEAD_WIDTH,), jnp.float32)
    b_head = b_head.at[0:4].set(params["b_out"][0])
    b_head = b_head.at[4:4 + NUM_FUNCTIONS].set(params["b_fn"][0])

    w_comp_img = params["w_img"] @ wf_img @ w_head             # [1024, 128]
    w_comp_q = wf_q @ w_head                                   # [256, 128]
    w_comp_prog = wf_prog @ w_head                             # [256, 128]
    # Input-values: Linear bias + "empty input" mask folded via augmented column.
    w_in_aug = jnp.concatenate([params["w_in"], params["b_in"]], axis=0)   # [5, 256]
    w_comp_in = jnp.zeros((INP_PAD, HEAD_WIDTH), jnp.float32)
    w_comp_in = w_comp_in.at[0:5].set(w_in_aug @ wf_in @ w_head)

    w_comp = jnp.concatenate(
        [w_comp_img, w_comp_q, w_comp_prog, w_comp_in], axis=0).astype(jnp.bfloat16)
    b_comp = ((params["b_img"][0] @ wf_img + params["b_fuse"][0]) @ w_head
              + b_head).reshape(1, HEAD_WIDTH)                 # f32

    return {
        "question_emb": params["question_emb"],
        "prog_emb": params["prog_emb"],
        "w_comp": w_comp,      # [1664, 128] bf16
        "b_comp": b_comp,      # [1, 128]    f32
    }


# ----------------------- batched device-side forward ------------------------

@jax.jit
def _batched_forward(kp, img, q_idx, q_len, inp, inp_len, prog_idx, prog_len):
    nb = img.shape[0]
    # Spatial mean without any transpose (reshape-only reduction).
    img_pooled = img.reshape(nb, IMG_CHANNELS, IMG_HW).mean(axis=2)        # [B, 1024]

    q_mask = (jnp.arange(q_idx.shape[1])[None, :] < q_len[:, None]).astype(jnp.float32)
    f_q = ((kp["question_emb"][q_idx] * q_mask[:, :, None]).sum(axis=1)
           / jnp.maximum(q_len, 1).astype(jnp.float32)[:, None])           # [B, 256]

    p_mask = (jnp.arange(prog_idx.shape[1])[None, :] < prog_len[:, None]).astype(jnp.float32)
    f_prog = ((kp["prog_emb"][prog_idx] * p_mask[:, :, None]).sum(axis=1)
              / jnp.maximum(prog_len, 1).astype(jnp.float32)[:, None])     # [B, 256]

    i_mask = (jnp.arange(inp.shape[1])[None, :] < inp_len[:, None]).astype(jnp.float32)
    mean_bbox = ((inp * i_mask[:, :, None]).sum(axis=1)
                 / jnp.maximum(inp_len, 1).astype(jnp.float32)[:, None])   # [B, 4]
    has_in = (inp_len > 0).astype(jnp.float32)[:, None]                    # [B, 1]
    inp_aug = jnp.concatenate(
        [mean_bbox, has_in, jnp.zeros((nb, INP_PAD - 5), jnp.float32)], axis=1)

    # Composite activation row, cast once to bf16 before the kernel.
    x = jnp.concatenate([img_pooled, f_q, f_prog, inp_aug], axis=1).astype(jnp.bfloat16)
    heads = _composite_heads(x, kp["w_comp"], kp["b_comp"])
    return heads[:, 0:4], heads[:, 4:4 + NUM_FUNCTIONS]


# ------------------------------ host-side glue -------------------------------

def predict_steps(kp, steps):
    """Batched forward over a list of (img_features, q_indices, input_values, prog_tokens).
    Ragged sequences are padded host-side to 8-aligned buckets so everything on
    device is a single jitted call (one pallas_call for the whole batch)."""
    nb = len(steps)
    q_lens = np.array([int(s[1].shape[0]) for s in steps], np.int32)
    in_lens = np.array([int(s[2].shape[0]) for s in steps], np.int32)
    p_lens = np.array([int(s[3].shape[0]) for s in steps], np.int32)
    qm = _round_up(max(int(q_lens.max()), 1), 8)
    im = _round_up(max(int(in_lens.max()), 1), 8)
    pm = _round_up(max(int(p_lens.max()), 1), 8)

    q_idx = np.zeros((nb, qm), np.int32)
    inp = np.zeros((nb, im, 4), np.float32)
    prog_idx = np.zeros((nb, pm), np.int32)
    for i, (_, q, iv, pt) in enumerate(steps):
        if q_lens[i] > 0:
            q_idx[i, :q_lens[i]] = np.asarray(q)
        if in_lens[i] > 0:
            inp[i, :in_lens[i]] = np.asarray(iv)
        if p_lens[i] > 0:
            prog_idx[i, :p_lens[i]] = np.asarray(pt)

    img = jnp.stack([s[0] for s in steps]).astype(jnp.float32)
    return _batched_forward(kp, img,
                            jnp.asarray(q_idx), jnp.asarray(q_lens),
                            jnp.asarray(inp), jnp.asarray(in_lens),
                            jnp.asarray(prog_idx), jnp.asarray(p_lens))


def compositional_step_predictor(kp, img_features, q_indices, input_values, prog_tokens):
    """Single-step API matching the PyTorch module's forward."""
    out, fn_logits = predict_steps(
        kp, [(img_features, q_indices, input_values, prog_tokens)])
    return out[0], fn_logits[0]


# ----------------------------- references ----------------------------------

def _composite_row(kp, img_features, q_indices, input_values, prog_tokens):
    """Eager single-step composite row (test helper only)."""
    img_pooled = img_features.reshape(IMG_CHANNELS, IMG_HW).mean(axis=1)
    f_q = kp["question_emb"][q_indices].mean(axis=0)
    if prog_tokens.shape[0] > 0:
        f_prog = kp["prog_emb"][prog_tokens].mean(axis=0)
    else:
        f_prog = jnp.zeros((D_MODEL,), jnp.float32)
    inp_aug = jnp.zeros((INP_PAD,), jnp.float32)
    if input_values.shape[0] > 0:
        inp_aug = inp_aug.at[0:4].set(input_values.mean(axis=0)).at[4].set(1.0)
    return jnp.concatenate([img_pooled, f_q, f_prog, inp_aug])


def _reference_matched(kp, img_features, q_indices, input_values, prog_tokens):
    """Pure-JAX reference with the SAME composite bf16-weight / f32-acc math as the kernel."""
    x = _composite_row(kp, img_features, q_indices, input_values, prog_tokens).astype(jnp.bfloat16)
    heads = jnp.dot(x, kp["w_comp"], preferred_element_type=jnp.float32) + kp["b_comp"][0]
    return heads[0:4], heads[4:4 + NUM_FUNCTIONS]


def _reference_f32(params, img_features, q_indices, input_values, prog_tokens):
    """Module-faithful full-f32 reference (PyTorch semantics)."""
    f_img = img_features.mean(axis=(1, 2)) @ params["w_img"] + params["b_img"][0]
    f_q = params["question_emb"][q_indices].mean(axis=0)
    if input_values.shape[0] > 0:
        f_in = (input_values @ params["w_in"] + params["b_in"][0]).mean(axis=0)
    else:
        f_in = jnp.zeros(D_MODEL)
    if prog_tokens.shape[0] > 0:
        f_prog = params["prog_emb"][prog_tokens].mean(axis=0)
    else:
        f_prog = jnp.zeros(D_MODEL)
    fused = jnp.concatenate([f_img, f_q, f_in, f_prog]) @ params["w_fuse"] + params["b_fuse"][0]
    return (fused @ params["w_out"] + params["b_out"][0],
            fused @ params["w_fn"] + params["b_fn"][0])


# ----------------------------- setup / demo --------------------------------

def make_params(key):
    ks = jax.random.split(key, 12)
    s = 0.02
    return {
        "w_img": s * jax.random.normal(ks[0], (IMG_CHANNELS, D_MODEL), jnp.float32),
        "b_img": s * jax.random.normal(ks[1], (1, D_MODEL), jnp.float32),
        "question_emb": s * jax.random.normal(ks[2], (QUESTION_VOCAB, D_MODEL), jnp.float32),
        "prog_emb": s * jax.random.normal(ks[3], (PROG_VOCAB, D_MODEL), jnp.float32),
        "w_in": s * jax.random.normal(ks[4], (4, D_MODEL), jnp.float32),
        "b_in": s * jax.random.normal(ks[5], (1, D_MODEL), jnp.float32),
        "w_fuse": s * jax.random.normal(ks[6], (4 * D_MODEL, D_MODEL), jnp.float32),
        "b_fuse": s * jax.random.normal(ks[7], (1, D_MODEL), jnp.float32),
        "w_out": s * jax.random.normal(ks[8], (D_MODEL, 4), jnp.float32),
        "b_out": s * jax.random.normal(ks[9], (1, 4), jnp.float32),
        "w_fn": s * jax.random.normal(ks[10], (D_MODEL, NUM_FUNCTIONS), jnp.float32),
        "b_fn": s * jax.random.normal(ks[11], (1, NUM_FUNCTIONS), jnp.float32),
    }


def tokenize_question(question_str, vocab_size=QUESTION_VOCAB):
    """Deterministic stand-in for the module's hash-based tokenizer
    (Python's built-in str hash is salted per process, so use a stable hash)."""
    def stable_hash(tok):
        h = 0
        for ch in tok:
            h = (h * 131 + ord(ch)) & 0x7FFFFFFF
        return h % vocab_size
    return jnp.array([stable_hash(t) for t in question_str.split()], jnp.int32)


if __name__ == "__main__":
    key = jax.random.PRNGKey(0)
    k_params, k_data = jax.random.split(key)
    params = make_params(k_params)
    kp = pack_params(params)

    questions = [
        "what color is the large metal cube behind the sphere",
        "how many small rubber things are there",
        "is there a red cylinder left of the cube",
        "what material is the big ball",
    ]

    # A batch of 16 program steps with varied question / input / prog lengths
    # (including empty input_values and empty prog_tokens), served by one
    # gridded pallas_call with a single composite matmul.
    steps = []
    for i, sk in enumerate(jax.random.split(k_data, 16)):
        k_img, k_in, k_prog = jax.random.split(sk, 3)
        img_features = jax.random.normal(k_img, (IMG_CHANNELS, 14, 14), jnp.float32)
        q_indices = tokenize_question(questions[i % len(questions)])
        n_in = i % 4                     # 0 -> empty input_values
        n_prog = i % 3                   # 0 -> empty prog_tokens
        input_values = jax.random.uniform(k_in, (n_in, 4), jnp.float32)
        prog_tokens = jax.random.randint(k_prog, (n_prog,), 0, PROG_VOCAB)
        steps.append((img_features, q_indices, input_values, prog_tokens))

    pred_out, pred_fn = predict_steps(kp, steps)
    jax.block_until_ready((pred_out, pred_fn))
    assert pred_out.shape == (len(steps), 4)
    assert pred_fn.shape == (len(steps), NUM_FUNCTIONS)

    for i, s in enumerate(steps):
        ref_out_m, ref_fn_m = _reference_matched(kp, *s)
        assert jnp.allclose(pred_out[i], ref_out_m, atol=1e-4), i
        assert jnp.allclose(pred_fn[i], ref_fn_m, atol=1e-4), i
        ref_out_f, ref_fn_f = _reference_f32(params, *s)
        assert jnp.allclose(pred_out[i], ref_out_f, atol=5e-3), i
        assert jnp.allclose(pred_fn[i], ref_fn_f, atol=5e-3), i

    # Single-step API (matches the module's forward signature semantics).
    single_out, single_fn = compositional_step_predictor(kp, *steps[0])
    jax.block_until_ready((single_out, single_fn))
    assert single_out.shape == (4,) and single_fn.shape == (NUM_FUNCTIONS,)
    assert jnp.allclose(single_out, pred_out[0], atol=1e-5)
    assert jnp.allclose(single_fn, pred_fn[0], atol=1e-5)

    print("KERNEL_OK")
</pallas_src>

<mosaic_0001>
module attributes {stable_mosaic.version = 11 : i64} {
  func.func @_composite_kernel(%arg0: i32, %arg1: memref<16x1664xbf16, #tpu.memory_space<vmem>>, %arg2: memref<1664x128xbf16, #tpu.memory_space<vmem>>, %arg3: memref<1x128xf32, #tpu.memory_space<vmem>>, %arg4: memref<16x128xf32, #tpu.memory_space<vmem>>) attributes {dimension_semantics = [#tpu.dimension_semantics<arbitrary>], iteration_bounds = array<i64: 1>, scalar_prefetch = 0 : i64, scratch_operands = 0 : i64, tpu.core_type = #tpu.core_type<tc>, window_params = [{transform_indices = @transform_0, window_bounds = array<i64: 16, 1664>}, {pipeline_mode = #tpu.pipeline_mode<synchronous>, transform_indices = @transform_1, window_bounds = array<i64: 1664, 128>}, {pipeline_mode = #tpu.pipeline_mode<synchronous>, transform_indices = @transform_2, window_bounds = array<i64: 1, 128>}, {transform_indices = @transform_3, window_bounds = array<i64: 16, 128>}]} {
    %c0 = arith.constant 0 : index
    %c0_0 = arith.constant 0 : index
    %0 = vector.load %arg1[%c0, %c0_0] : memref<16x1664xbf16, #tpu.memory_space<vmem>>, vector<16x1664xbf16>
    %c0_1 = arith.constant 0 : index
    %c0_2 = arith.constant 0 : index
    %1 = vector.load %arg2[%c0_1, %c0_2] : memref<1664x128xbf16, #tpu.memory_space<vmem>>, vector<1664x128xbf16>
    %cst = arith.constant dense<0.000000e+00> : vector<16x128xf32>
    %2 = tpu.matmul %0, %1, %cst {dimension_numbers = #tpu.dot_dimension_numbers<[1], [0], [0], [1], [0, 0, 1, 1], [], []>} : vector<16x1664xbf16>, vector<1664x128xbf16>, vector<16x128xf32> -> vector<16x128xf32>
    %c0_3 = arith.constant 0 : index
    %c0_4 = arith.constant 0 : index
    %3 = vector.load %arg3[%c0_3, %c0_4] : memref<1x128xf32, #tpu.memory_space<vmem>>, vector<1x128xf32>
    %4 = vector.broadcast %3 : vector<1x128xf32> to vector<16x128xf32>
    %5 = arith.addf %2, %4 : vector<16x128xf32>
    %c0_5 = arith.constant 0 : index
    %c0_6 = arith.constant 0 : index
    %6 = vector.load %arg4[%c0_5, %c0_6] : memref<16x128xf32, #tpu.memory_space<vmem>>, vector<16x128xf32>
    tpu.vector_store %arg4[%c0_5, %c0_6], %5 {strides = array<i32>} : memref<16x128xf32, #tpu.memory_space<vmem>>, vector<16x128xf32>,
    return
  }
  func.func @transform_0(%arg0: i32) -> (i32, i32) {
    %c0_i32 = arith.constant 0 : i32
    %c0_i32_0 = arith.constant 0 : i32
    return %arg0, %c0_i32 : i32, i32
  }
  func.func @transform_1(%arg0: i32) -> (i32, i32) {
    %c0_i32 = arith.constant 0 : i32
    %c0_i32_0 = arith.constant 0 : i32
    %c0_i32_1 = arith.constant 0 : i32
    return %c0_i32, %c0_i32_0 : i32, i32
  }
  func.func @transform_2(%arg0: i32) -> (i32, i32) {
    %c0_i32 = arith.constant 0 : i32
    %c0_i32_0 = arith.constant 0 : i32
    %c0_i32_1 = arith.constant 0 : i32
    return %c0_i32, %c0_i32_0 : i32, i32
  }
  func.func @transform_3(%arg0: i32) -> (i32, i32) {
    %c0_i32 = arith.constant 0 : i32
    %c0_i32_0 = arith.constant 0 : i32
    return %arg0, %c0_i32 : i32, i32
  }
}

</mosaic_0001>

<bundles_post_ra>
// kernel: _batched_forward.1
= control target key start
LH: loop header
LB: loop body
LE: loop exit
PB: predicated region body
PF: predicated region fallthrough
CT: control target
= control target key end

     0   :  { %vm1632_vm0 = vmmov 0   ;;  %s2013_s1 = inlined_call_operand.vmem [shape: bf16[1664,128], index: 1, kind: input, shape index: {}]   ;;  %s2014_s0 = inlined_call_operand.vmem [shape: bf16[16,1664], index: 0, kind: input, shape index: {}]   ;;  %s2015_s2 = inlined_call_operand.vmem [shape: f32[1,128], index: 2, kind: input, shape index: {}]   ;;  %s2016_s3 = inlined_call_operand.vmem [shape: f32[16,128], index: 3, kind: output, shape index: {}]  }
   0x1   :  { %v1508_v0 = vld [vmem:[%s2013_s1 + $0x40] sm:$0xff]   ;;  %v1512_v4 = vld [vmem:[%s2013_s1 + $0x48] sm:$0xff]   ;;  %v1516_v8 = vld [vmem:[%s2013_s1 + $0x50] sm:$0xff]  }
   0x2   :  { %v1509_v1 = vld [vmem:[%s2013_s1] sm:$0xff]   ;;  %1345 = vmatprep.subr.bf16.mxu0 %v1508_v0  ;;  %v1513_v5 = vld [vmem:[%s2013_s1 + $0x8] sm:$0xff]   ;;  %v1517_v9 = vld [vmem:[%s2013_s1 + $0x10] sm:$0xff]  }
   0x3   :  { %v1510_v2 = vld [vmem:[%s2013_s1 + $0xc0] sm:$0xff]   ;;  %1346 = vmatpush3.bf16.msra.mxu0 %v1509_v1  ;;  %v1514_v6 = vld [vmem:[%s2013_s1 + $0xc8] sm:$0xff]   ;;  %v1518_v10 = vld [vmem:[%s2013_s1 + $0xd0] sm:$0xff]  }
   0x4   :  { %v1511_v3 = vld [vmem:[%s2013_s1 + $0x80] sm:$0xff]   ;;  %1367 = vmatprep.subr.bf16.mxu1 %v1510_v2  ;;  %1347 = vmatprep.subr.bf16.mxu0 %v1512_v4  ;;  %v1515_v7 = vld [vmem:[%s2013_s1 + $0x88] sm:$0xff]   ;;  %v1519_v11 = vld [vmem:[%s2013_s1 + $0x90] sm:$0xff]  }
   0x5   :  { %1368 = vmatpush3.bf16.msra.mxu1 %v1511_v3  ;;  %v1520_v12 = vld [vmem:[%s2013_s1 + $0x58] sm:$0xff]   ;;  %v1524_v16 = vld [vmem:[%s2013_s1 + $0x60] sm:$0xff]   ;;  %v1528_v20 = vld [vmem:[%s2013_s1 + $0x68] sm:$0xff]  }
   0x6   :  { %1369 = vmatprep.subr.bf16.mxu1 %v1514_v6  ;;  %v1521_v13 = vld [vmem:[%s2013_s1 + $0x18] sm:$0xff]   ;;  %v1525_v17 = vld [vmem:[%s2013_s1 + $0x20] sm:$0xff]   ;;  %v1529_v21 = vld [vmem:[%s2013_s1 + $0x28] sm:$0xff]  }
   0x7   :  { %1348 = vmatpush3.bf16.msra.mxu0 %v1513_v5  ;;  %v1522_v14 = vld [vmem:[%s2013_s1 + $0xd8] sm:$0xff]   ;;  %v1526_v18 = vld [vmem:[%s2013_s1 + $0xe0] sm:$0xff]   ;;  %v1530_v22 = vld [vmem:[%s2013_s1 + $0xe8] sm:$0xff]  }
   0x8   :  { %1349 = vmatprep.subr.bf16.mxu0 %v1516_v8  ;;  %v1523_v15 = vld [vmem:[%s2013_s1 + $0x98] sm:$0xff]   ;;  %v1527_v19 = vld [vmem:[%s2013_s1 + $0xa0] sm:$0xff]   ;;  %v1531_v23 = vld [vmem:[%s2013_s1 + $0xa8] sm:$0xff]  }
   0x9   :  { %1370 = vmatpush3.bf16.msra.mxu1 %v1515_v7  ;;  %v1532_v24 = vld [vmem:[%s2013_s1 + $0x70] sm:$0xff]   ;;  %v1536_v28 = vld [vmem:[%s2013_s1 + $0x78] sm:$0xff]   ;;  %v1543_v34 = vld [vmem:[%s2013_s1 + $0x140] sm:$0xff]  }
   0xa   :  { %1371 = vmatprep.subr.bf16.mxu1 %v1518_v10  ;;  %v1533_v25 = vld [vmem:[%s2013_s1 + $0x30] sm:$0xff]   ;;  %v1537_v29 = vld [vmem:[%s2013_s1 + $0x38] sm:$0xff]   ;;  %v1546_v36 = vld [vmem:[%s2014_s0 + $0xc] ss:$52 sps:$4 sm:$0xff]  }
   0xb   :  { %1350 = vmatpush3.bf16.msra.mxu0 %v1517_v9  ;;  %v1534_v26 = vld [vmem:[%s2013_s1 + $0xf0] sm:$0xff]   ;;  %v1538_v30 = vld [vmem:[%s2013_s1 + $0xf8] sm:$0xff]   ;;  %v1547_v37 = vld [vmem:[%s2013_s1 + $0x100] sm:$0xff]   ;;  %1007 = vmatprep.mubr.bf16.mxu1 %v1546_v36 }
   0xc   :  { %1351 = vmatprep.subr.bf16.mxu0 %v1520_v12  ;;  %v1535_v27 = vld [vmem:[%s2013_s1 + $0xb0] sm:$0xff]   ;;  %v1541_v32 = vld [vmem:[%s2014_s0 + $0x4] ss:$52 sps:$4 sm:$0xff]   ;;  %v1544_v35 = vld [vmem:[%s2014_s0 + $0x8] ss:$52 sps:$4 sm:$0xff]  }
   0xd   :  { %1372 = vmatpush3.bf16.msra.mxu1 %v1519_v11  ;;  %v1539_v31 = vld [vmem:[%s2014_s0] ss:$52 sps:$4 sm:$0xff]   ;;  %v1542_v33 = vld [vmem:[%s2013_s1 + $0xb8] sm:$0xff]   ;;  %966 = vmatprep.mubr.bf16.mxu0 %v1541_v32  ;;  %v1550_v40 = vld [vmem:[%s2013_s1 + $0x148] sm:$0xff]  }
   0xe   :  { %1373 = vmatprep.subr.bf16.mxu1 %v1522_v14  ;;  %v1548_v38 = vld [vmem:[%s2013_s1 + $0x1c0] sm:$0xff]   ;;  %v1551_v41 = vld [vmem:[%s2013_s1 + $0x108] sm:$0xff]   ;;  %v1554_v44 = vld [vmem:[%s2013_s1 + $0x150] sm:$0xff]  }
   0xf   :  { %1352 = vmatpush3.bf16.msra.mxu0 %v1521_v13  ;;  %v1549_v39 = vld [vmem:[%s2013_s1 + $0x180] sm:$0xff]   ;;  %v1552_v42 = vld [vmem:[%s2013_s1 + $0x1c8] sm:$0xff]   ;;  %v1555_v45 = vld [vmem:[%s2013_s1 + $0x110] sm:$0xff]  }
  0x10   :  { %1353 = vmatprep.subr.bf16.mxu0 %v1524_v16  ;;  %v1553_v43 = vld [vmem:[%s2013_s1 + $0x188] sm:$0xff]   ;;  %v1556_v46 = vld [vmem:[%s2013_s1 + $0x1d0] sm:$0xff]   ;;  %v1558_v48 = vld [vmem:[%s2013_s1 + $0x158] sm:$0xff]  }
  0x11   :  { %1374 = vmatpush3.bf16.msra.mxu1 %v1523_v15  ;;  %v1557_v47 = vld [vmem:[%s2013_s1 + $0x190] sm:$0xff]   ;;  %v1559_v49 = vld [vmem:[%s2013_s1 + $0x118] sm:$0xff]   ;;  %v1562_v52 = vld [vmem:[%s2013_s1 + $0x160] sm:$0xff]  }
  0x12   :  { %1375 = vmatprep.subr.bf16.mxu1 %v1526_v18  ;;  %v1560_v50 = vld [vmem:[%s2013_s1 + $0x1d8] sm:$0xff]   ;;  %v1563_v53 = vld [vmem:[%s2013_s1 + $0x120] sm:$0xff]   ;;  %v1566_v56 = vld [vmem:[%s2013_s1 + $0x168] sm:$0xff]  }
  0x13   :  { %1354 = vmatpush3.bf16.msra.mxu0 %v1525_v17  ;;  %v1561_v51 = vld [vmem:[%s2013_s1 + $0x198] sm:$0xff]   ;;  %v1564_v54 = vld [vmem:[%s2013_s1 + $0x1e0] sm:$0xff]   ;;  %v1567_v57 = vld [vmem:[%s2013_s1 + $0x128] sm:$0xff]  }
  0x14   :  { %1355 = vmatprep.subr.bf16.mxu0 %v1528_v20  ;;  %v1565_v55 = vld [vmem:[%s2013_s1 + $0x1a0] sm:$0xff]   ;;  %v1568_v58 = vld [vmem:[%s2013_s1 + $0x1e8] sm:$0xff]   ;;  %v1570_v60 = vld [vmem:[%s2013_s1 + $0x170] sm:$0xff]  }
  0x15   :  { %1376 = vmatpush3.bf16.msra.mxu1 %v1527_v19  ;;  %v1569_v59 = vld [vmem:[%s2013_s1 + $0x1a8] sm:$0xff]   ;;  %v1571_v61 = vld [vmem:[%s2013_s1 + $0x130] sm:$0xff]   ;;  %v1574_v0 = vld [vmem:[%s2013_s1 + $0x178] sm:$0xff]  }
  0x16   :  { %1377 = vmatprep.subr.bf16.mxu1 %v1530_v22  ;;  %v1572_v62 = vld [vmem:[%s2013_s1 + $0x1f0] sm:$0xff]   ;;  %v1575_v1 = vld [vmem:[%s2013_s1 + $0x138] sm:$0xff]   ;;  %v1581_v6 = vld [vmem:[%s2013_s1 + $0x240] sm:$0xff]  }
  0x17   :  { %1356 = vmatpush3.bf16.msra.mxu0 %v1529_v21  ;;  %v1573_v63 = vld [vmem:[%s2013_s1 + $0x1b0] sm:$0xff]   ;;  %v1576_v2 = vld [vmem:[%s2013_s1 + $0x1f8] sm:$0xff]   ;;  %v1585_v9 = vld [vmem:[%s2013_s1 + $0x200] sm:$0xff]  }
  0x18   :  { %1357 = vmatprep.subr.bf16.mxu0 %v1532_v24  ;;  %v1577_v3 = vld [vmem:[%s2014_s0 + $0x10] ss:$52 sps:$4 sm:$0xff]   ;;  %v1579_v4 = vld [vmem:[%s2014_s0 + $0x14] ss:$52 sps:$4 sm:$0xff]   ;;  %v1580_v5 = vld [vmem:[%s2013_s1 + $0x1b8] sm:$0xff]  }
  0x19   :  { %1378 = vmatpush3.bf16.msra.mxu1 %v1531_v23  ;;  %v1582_v7 = vld [vmem:[%s2014_s0 + $0x18] ss:$52 sps:$4 sm:$0xff]   ;;  %v1584_v8 = vld [vmem:[%s2014_s0 + $0x1c] ss:$52 sps:$4 sm:$0xff]   ;;  %v1586_v10 = vld [vmem:[%s2013_s1 + $0x2c0] sm:$0xff]  }
  0x1a   :  { %1379 = vmatprep.subr.bf16.mxu1 %v1534_v26  ;;  %v1587_v11 = vld [vmem:[%s2013_s1 + $0x280] sm:$0xff]   ;;  %v1588_v12 = vld [vmem:[%s2013_s1 + $0x248] sm:$0xff]   ;;  %v1592_v16 = vld [vmem:[%s2013_s1 + $0x250] sm:$0xff]  }
  0x1b   :  { %1358 = vmatpush3.bf16.msra.mxu0 %v1533_v25  ;;  %v1589_v13 = vld [vmem:[%s2013_s1 + $0x208] sm:$0xff]   ;;  %v1593_v17 = vld [vmem:[%s2013_s1 + $0x210] sm:$0xff]   ;;  %v1596_v20 = vld [vmem:[%s2013_s1 + $0x258] sm:$0xff]  }
  0x1c   :  { %1359 = vmatprep.subr.bf16.mxu0 %v1536_v28  ;;  %v1590_v14 = vld [vmem:[%s2013_s1 + $0x2c8] sm:$0xff]   ;;  %v1594_v18 = vld [vmem:[%s2013_s1 + $0x2d0] sm:$0xff]   ;;  %v1597_v21 = vld [vmem:[%s2013_s1 + $0x218] sm:$0xff]  }
  0x1d   :  { %1380 = vmatpush3.bf16.msra.mxu1 %v1535_v27  ;;  %v1591_v15 = vld [vmem:[%s2013_s1 + $0x288] sm:$0xff]   ;;  %v1595_v19 = vld [vmem:[%s2013_s1 + $0x290] sm:$0xff]   ;;  %v1598_v22 = vld [vmem:[%s2013_s1 + $0x2d8] sm:$0xff]  }
  0x1e   :  { %1381 = vmatprep.subr.bf16.mxu1 %v1538_v30  ;;  %v1599_v23 = vld [vmem:[%s2013_s1 + $0x298] sm:$0xff]   ;;  %v1600_v24 = vld [vmem:[%s2013_s1 + $0x260] sm:$0xff]   ;;  %v1604_v28 = vld [vmem:[%s2013_s1 + $0x268] sm:$0xff]  }
  0x1f   :  { %1360 = vmatpush3.bf16.msra.mxu0 %v1537_v29  ;;  %v1601_v25 = vld [vmem:[%s2013_s1 + $0x220] sm:$0xff]   ;;  %v1605_v29 = vld [vmem:[%s2013_s1 + $0x228] sm:$0xff]   ;;  %v1608_v32 = vld [vmem:[%s2013_s1 + $0x270] sm:$0xff]  }
  0x20   :  { %1389 = vmatprep.subr.bf16.mxu0 %v1543_v34  ;;  %v1602_v26 = vld [vmem:[%s2013_s1 + $0x2e0] sm:$0xff]   ;;  %v1606_v30 = vld [vmem:[%s2013_s1 + $0x2e8] sm:$0xff]   ;;  %v1610_v34 = vld [vmem:[%s2013_s1 + $0x2f0] sm:$0xff]  }
  0x21   :  { %1382 = vmatpush3.bf16.msra.mxu1 %v1542_v33  ;;  %v1603_v27 = vld [vmem:[%s2013_s1 + $0x2a0] sm:$0xff]   ;;  %v1609_v33 = vld [vmem:[%s2013_s1 + $0x230] sm:$0xff]   ;;  %v1612_v36 = vld [vmem:[%s2013_s1 + $0x278] sm:$0xff]  }
  0x22   :  { %967 = vmatmul.mubr.bf16.vlgmr.msra.gmra.mrb[0].mxu0 %v1539_v31  ;;  %1411 = vmatprep.subr.bf16.mxu1 %v1548_v38  ;;  %v1607_v31 = vld [vmem:[%s2013_s1 + $0x2a8] sm:$0xff]   ;;  %v1614_v38 = vld [vmem:[%s2013_s1 + $0x2f8] sm:$0xff]  }
  0x23   :  { %1390 = vmatpush3.bf16.msra.mxu0 %v1547_v37  ;;  %1048 = vmatprep.mubr.bf16.mxu0 %v1579_v4  ;;  %v1613_v37 = vld [vmem:[%s2013_s1 + $0x238] sm:$0xff]  }
  0x24   :  { %1008 = vmatmul.mubr.bf16.vlgmr.msra.gmra.mrb[0].mxu1 %v1544_v35  ;;  %1391 = vmatprep.subr.bf16.mxu0 %v1550_v40  ;;  %v1611_v35 = vld [vmem:[%s2013_s1 + $0x2b0] sm:$0xff]   ;;  %v1617_v40 = vld [vmem:[%s2014_s0 + $0x24] ss:$52 sps:$4 sm:$0xff]  }
  0x25   :  { %1412 = vmatpush3.bf16.msra.mxu1 %v1549_v39  ;;  %1089 = vmatprep.mubr.bf16.mxu1 %v1584_v8  ;;  %v1615_v39 = vld [vmem:[%s2014_s0 + $0x20] ss:$52 sps:$4 sm:$0xff]  }
  0x26   :  { %1413 = vmatprep.subr.bf16.mxu1 %v1552_v42  ;;  %v1631_v42 = vmov 0.0  }
  0x27   :  { %1392 = vmatpush3.bf16.msra.mxu0 %v1551_v41  ;;  %v1618_v41 = vld [vmem:[%s2013_s1 + $0x2b8] sm:$0xff]  }
  0x28   :  { %1393 = vmatprep.subr.bf16.mxu0 %v1554_v44  ;;  %v1621_v44 = vld [vmem:[%s2014_s0 + $0x2c] ss:$52 sps:$4 sm:$0xff]  }
  0x29   :  { %1414 = vmatpush3.bf16.msra.mxu1 %v1553_v43  ;;  %v1619_v43 = vld [vmem:[%s2014_s0 + $0x28] ss:$52 sps:$4 sm:$0xff]  }
  0x2a   :  { %1415 = vmatprep.subr.bf16.mxu1 %v1556_v46  ;;  %v1623_v46 = vld [vmem:[%s2013_s1 + $0x308] sm:$0xff]  }
  0x2b   :  { %1394 = vmatpush3.bf16.msra.mxu0 %v1555_v45  ;;  %v1622_v45 = vld [vmem:[%s2013_s1 + $0x300] sm:$0xff]  }
  0x2c   :  { %1395 = vmatprep.subr.bf16.mxu0 %v1558_v48  ;;  %v1625_v48 = vld [vmem:[%s2013_s1 + $0x318] sm:$0xff]  }
  0x2d   :  { %1416 = vmatpush3.bf16.msra.mxu1 %v1557_v47  ;;  %v1624_v47 = vld [vmem:[%s2013_s1 + $0x310] sm:$0xff]  }
  0x2e   :  { %1417 = vmatprep.subr.bf16.mxu1 %v1560_v50  ;;  %v1627_v50 = vld [vmem:[%s2013_s1 + $0x328] sm:$0xff]  }
  0x2f   :  { %1396 = vmatpush3.bf16.msra.mxu0 %v1559_v49  ;;  %v1626_v49 = vld [vmem:[%s2013_s1 + $0x320] sm:$0xff]  }
  0x30   :  { %1397 = vmatprep.subr.bf16.mxu0 %v1562_v52  ;;  %v1629_v52 = vld [vmem:[%s2013_s1 + $0x338] sm:$0xff]  }
  0x31   :  { %1418 = vmatpush3.bf16.msra.mxu1 %v1561_v51  ;;  %v1628_v51 = vld [vmem:[%s2013_s1 + $0x330] sm:$0xff]  }
  0x32   :  { %1419 = vmatprep.subr.bf16.mxu1 %v1564_v54 }
  0x33   :  { %1398 = vmatpush3.bf16.msra.mxu0 %v1563_v53  ;;  %v1630_v53 = vld [vmem:[%s2014_s0 + $0x30] ss:$52 sps:$4 sm:$0xff]  }
  0x34   :  { %1399 = vmatprep.subr.bf16.mxu0 %v1566_v56 }
  0x35   :  { %1420 = vmatpush3.bf16.msra.mxu1 %v1565_v55  ;;  %v1227_v55 = vld [vmem:[%s2015_s2] ss:$0 sm:$0xff] }
  0x36   :  { %1421 = vmatprep.subr.bf16.mxu1 %v1568_v58 }
  0x37   :  { %1400 = vmatpush3.bf16.msra.mxu0 %v1567_v57 }
  0x38   :  { %1401 = vmatprep.subr.bf16.mxu0 %v1570_v60 }
  0x39   :  { %1422 = vmatpush3.bf16.msra.mxu1 %v1569_v59 }
  0x3a   :  { %1423 = vmatprep.subr.bf16.mxu1 %v1572_v62 }
  0x3b   :  { %1402 = vmatpush3.bf16.msra.mxu0 %v1571_v61 }
  0x3c   :  { %1403 = vmatprep.subr.bf16.mxu0 %v1574_v0 }
  0x3d   :  { %1424 = vmatpush3.bf16.msra.mxu1 %v1573_v63 }
  0x3e   :  { %1425 = vmatprep.subr.bf16.mxu1 %v1576_v2 }
  0x3f   :  { %1404 = vmatpush3.bf16.msra.mxu0 %v1575_v1 }
  0x40   :  { %1433 = vmatprep.subr.bf16.mxu0 %v1581_v6 }
  0x41   :  { %1426 = vmatpush3.bf16.msra.mxu1 %v1580_v5 }
  0x42   :  { %1049 = vmatmul.mubr.bf16.vlgmr.msra.gmra.mrb[4].mxu0 %v1577_v3  ;;  %1455 = vmatprep.subr.bf16.mxu1 %v1586_v10 }
  0x43   :  { %1434 = vmatpush3.bf16.msra.mxu0 %v1585_v9  ;;  %1130 = vmatprep.mubr.bf16.mxu0 %v1617_v40 }
  0x44   :  { %1090 = vmatmul.mubr.bf16.vlgmr.msra.gmra.mrb[4].mxu1 %v1582_v7  ;;  %1435 = vmatprep.subr.bf16.mxu0 %v1588_v12 }
  0x45   :  { %1456 = vmatpush3.bf16.msra.mxu1 %v1587_v11  ;;  %1171 = vmatprep.mubr.bf16.mxu1 %v1621_v44 }
  0x46   :  { %1457 = vmatprep.subr.bf16.mxu1 %v1590_v14 }
  0x47   :  { %1436 = vmatpush3.bf16.msra.mxu0 %v1589_v13 }
  0x48   :  { %1437 = vmatprep.subr.bf16.mxu0 %v1592_v16 }
  0x49   :  { %1458 = vmatpush3.bf16.msra.mxu1 %v1591_v15 }
  0x4a   :  { %1459 = vmatprep.subr.bf16.mxu1 %v1594_v18 }
  0x4b   :  { %1438 = vmatpush3.bf16.msra.mxu0 %v1593_v17 }
  0x4c   :  { %1439 = vmatprep.subr.bf16.mxu0 %v1596_v20 }
  0x4d   :  { %1460 = vmatpush3.bf16.msra.mxu1 %v1595_v19 }
  0x4e   :  { %1461 = vmatprep.subr.bf16.mxu1 %v1598_v22 }
  0x4f   :  { %1440 = vmatpush3.bf16.msra.mxu0 %v1597_v21 }
  0x50   :  { %1441 = vmatprep.subr.bf16.mxu0 %v1600_v24 }
  0x51   :  { %1462 = vmatpush3.bf16.msra.mxu1 %v1599_v23 }
  0x52   :  { %1463 = vmatprep.subr.bf16.mxu1 %v1602_v26 }
  0x53   :  { %1442 = vmatpush3.bf16.msra.mxu0 %v1601_v25 }
  0x54   :  { %1443 = vmatprep.subr.bf16.mxu0 %v1604_v28 }
  0x55   :  { %1464 = vmatpush3.bf16.msra.mxu1 %v1603_v27 }
  0x56   :  { %1465 = vmatprep.subr.bf16.mxu1 %v1606_v30 }
  0x57   :  { %1444 = vmatpush3.bf16.msra.mxu0 %v1605_v29 }
  0x58   :  { %1445 = vmatprep.subr.bf16.mxu0 %v1608_v32 }
  0x59   :  { %1466 = vmatpush3.bf16.msra.mxu1 %v1607_v31 }
  0x5a   :  { %1467 = vmatprep.subr.bf16.mxu1 %v1610_v34 }
  0x5b   :  { %1446 = vmatpush3.bf16.msra.mxu0 %v1609_v33 }
  0x5c   :  { %1447 = vmatprep.subr.bf16.mxu0 %v1612_v36 }
  0x5d   :  { %1468 = vmatpush3.bf16.msra.mxu1 %v1611_v35 }
  0x5e   :  { %1469 = vmatprep.subr.bf16.mxu1 %v1614_v38 }
  0x5f   :  { %1448 = vmatpush3.bf16.msra.mxu0 %v1613_v37 }
  0x60   :  { %1486 = vmatprep.subr.bf16.mxu0 %v1631_v42 }
  0x61   :  { %1470 = vmatpush3.bf16.msra.mxu1 %v1618_v41 }
  0x62   :  { %1131 = vmatmul.mubr.bf16.vlgmr.msra.gmra.mrb[8].mxu0 %v1615_v39 }
  0x63   :  { %1502 = vmatprep.mubr.msk.bf16.mxu0 %vm1632_vm0, %v1631_v42  ;;  %1487 = vmatpush3.bf16.msra.mxu0 %v1622_v45 }
  0x64   :  { %1172 = vmatmul.mubr.bf16.vlgmr.msra.gmra.mrb[8].mxu1 %v1619_v43  ;;  %1488 = vmatprep.subr.bf16.mxu0 %v1631_v42 }
  0x67   :  { %1489 = vmatpush3.bf16.msra.mxu0 %v1623_v46 }
  0x68   :  { %1490 = vmatprep.subr.bf16.mxu0 %v1631_v42 }
  0x6b   :  { %1491 = vmatpush3.bf16.msra.mxu0 %v1624_v47 }
  0x6c   :  { %1492 = vmatprep.subr.bf16.mxu0 %v1631_v42 }
  0x6f   :  { %1493 = vmatpush3.bf16.msra.mxu0 %v1625_v48 }
  0x70   :  { %1494 = vmatprep.subr.bf16.mxu0 %v1631_v42 }
  0x73   :  { %1495 = vmatpush3.bf16.msra.mxu0 %v1626_v49 }
  0x74   :  { %1496 = vmatprep.subr.bf16.mxu0 %v1631_v42 }
  0x77   :  { %1497 = vmatpush3.bf16.msra.mxu0 %v1627_v50 }
  0x78   :  { %1498 = vmatprep.subr.bf16.mxu0 %v1631_v42 }
  0x7b   :  { %1499 = vmatpush3.bf16.msra.mxu0 %v1628_v51 }
  0x7c   :  { %1500 = vmatprep.subr.bf16.mxu0 %v1631_v42 }
  0x7f   :  { %1501 = vmatpush3.bf16.msra.mxu0 %v1629_v52 }
  0x82   :  { %1503 = vmatmul.mubr.bf16.vlgmr.msra.gmra.mrb[12].mxu0 %v1630_v53 }
  0xf5   :  { %v1361_v54 = vpop.f32.mrb[0].mxu0 }
  0xf6   :  { %v1362_v56 = vpop.f32.mrb[1].mxu0 }
  0xf7   :  { %v1363_v57 = vadd.f32 %v1362_v56, %v1361_v54  ;;  %v1364_v58 = vpop.f32.mrb[2].mxu0  ;;  %v1383_v59 = vpop.f32.mrb[0].mxu1 }
  0xf8   :  { %v1365_v60 = vpop.f32.mrb[3].mxu0  ;;  %v1384_v63 = vpop.f32.mrb[1].mxu1 }
  0xf9   :  { %v969_v61 = vadd.f32 %v1363_v57, %v1227_v55  ;;  %v1366_v62 = vadd.f32 %v1365_v60, %v1364_v58  ;;  %v1385_v0 = vadd.f32 %v1384_v63, %v1383_v59  ;;  %v1386_v1 = vpop.f32.mrb[2].mxu1 }
  0xfa   :  { %v1387_v3 = vpop.f32.mrb[3].mxu1 }
  0xfb   :  { %v972_v2 = vadd.f32 %v1366_v62, %v1227_v55  ;;  %v1010_v4 = vadd.f32 %v1385_v0, %v969_v61  ;;  %v1388_v5 = vadd.f32 %v1387_v3, %v1386_v1 }
  0xfd   :  { %v1013_v6 = vadd.f32 %v1388_v5, %v972_v2 }
 0x115   :  { %v1405_v7 = vpop.f32.mrb[4].mxu0 }
 0x116   :  { %v1406_v8 = vpop.f32.mrb[5].mxu0 }
 0x117   :  { %v1407_v9 = vadd.f32 %v1406_v8, %v1405_v7  ;;  %v1408_v10 = vpop.f32.mrb[6].mxu0  ;;  %v1427_v13 = vpop.f32.mrb[4].mxu1 }
 0x118   :  { %v1409_v11 = vpop.f32.mrb[7].mxu0  ;;  %v1428_v15 = vpop.f32.mrb[5].mxu1 }
 0x119   :  { %v1051_v12 = vadd.f32 %v1407_v9, %v1010_v4  ;;  %v1410_v14 = vadd.f32 %v1409_v11, %v1408_v10  ;;  %v1429_v17 = vadd.f32 %v1428_v15, %v1427_v13  ;;  %v1430_v18 = vpop.f32.mrb[6].mxu1 }
 0x11a   :  { %v1431_v19 = vpop.f32.mrb[7].mxu1 }
 0x11b   :  { %v1054_v16 = vadd.f32 %v1410_v14, %v1013_v6  ;;  %v1092_v20 = vadd.f32 %v1429_v17, %v1051_v12  ;;  %v1432_v21 = vadd.f32 %v1431_v19, %v1430_v18 }
 0x11d   :  { %v1095_v22 = vadd.f32 %v1432_v21, %v1054_v16 }
 0x135   :  { %v1449_v23 = vpop.f32.mrb[8].mxu0 }
 0x136   :  { %v1450_v24 = vpop.f32.mrb[9].mxu0 }
 0x137   :  { %v1451_v25 = vadd.f32 %v1450_v24, %v1449_v23  ;;  %v1452_v26 = vpop.f32.mrb[10].mxu0  ;;  %v1471_v27 = vpop.f32.mrb[8].mxu1 }
 0x138   :  { %v1453_v28 = vpop.f32.mrb[11].mxu0  ;;  %v1472_v31 = vpop.f32.mrb[9].mxu1 }
 0x139   :  { %v1133_v29 = vadd.f32 %v1451_v25, %v1092_v20  ;;  %v1454_v30 = vadd.f32 %v1453_v28, %v1452_v26  ;;  %v1473_v32 = vadd.f32 %v1472_v31, %v1471_v27  ;;  %v1474_v33 = vpop.f32.mrb[10].mxu1 }
 0x13a   :  { %v1475_v35 = vpop.f32.mrb[11].mxu1 }
 0x13b   :  { %v1136_v34 = vadd.f32 %v1454_v30, %v1095_v22  ;;  %v1476_v36 = vadd.f32 %v1475_v35, %v1474_v33  ;;  %v1174_v37 = vadd.f32 %v1473_v32, %v1133_v29 }
 0x13d   :  { %v1177_v38 = vadd.f32 %v1476_v36, %v1136_v34 }
 0x155   :  { %v1214_v39 = vpop.f32.mrb[12].mxu0 }
 0x156   :  { %v1215_v40 = vadd.f32 %v1214_v39, %v1174_v37  ;;  %v1504_v41 = vpop.f32.mrb[13].mxu0 }
 0x157   :  { %v1217_v42 = vpop.f32.mrb[14].mxu0 }
 0x158   :  { %1221 = vst [vmem:[%s2016_s3] sm:$0xff] %v1215_v40  ;;  %v1218_v43 = vadd.f32 %v1217_v42, %v1177_v38  ;;  %v1505_v44 = vpop.f32.mrb[15].mxu0 }
 0x15a   :  { %1222 = vst [vmem:[%s2016_s3 + $0x8] sm:$0xff] %v1218_v43 }

</bundles_post_ra>
